<compile_context>
chip_gen: v5e
topology: v5e:2x2
jax: 0.10.0
libtpu: 0.0.40
codegen_flags: <defaults>
</compile_context>

<pallas_src>
import jax
import jax.numpy as jnp
from jax.experimental import pallas as pl
from jax.experimental.pallas import tpu as pltpu


def _cdiv(a, b):
    return -(-a // b)


def attention_connection_kernel(param_ref, f_ref, a_ref, o_ref):
    # param_ref: (1,) scalar in SMEM; f_ref/a_ref/o_ref: (block_rows, lanes) VMEM tiles.
    # Compute in the output (promoted) dtype; astype is a no-op in the common all-f32 case.
    dt = o_ref.dtype
    p = param_ref[0].astype(dt)
    o_ref[...] = (a_ref[...].astype(dt) + p) * f_ref[...].astype(dt)


def _vmem_limit_bytes():
    # v5e/v6e: 128 MiB physical VMEM -> allow 64 MiB scoped; v7x: 64 MiB/TC -> 32 MiB.
    try:
        cap = int(pltpu.get_tpu_info().vmem_capacity_bytes)
    except Exception:
        cap = 64 * 1024 * 1024
    return int(max(16 * 1024 * 1024, min(cap // 2, 64 * 1024 * 1024)))


def attention_connection(feature, attention, param):
    """out = (param + attention) * feature  (forward of AttentionConnection)."""
    orig_shape = feature.shape
    param = jnp.asarray(param).reshape((1,))

    # PyTorch type promotion of (param + attention) * feature.
    out_dtype = jnp.result_type(param.dtype, attention.dtype, feature.dtype)

    # Broadcast attention onto feature only if shapes differ (no copy in the normal case).
    if attention.shape != orig_shape:
        # TODO(synk): replicate a genuinely-small `attention` via the BlockSpec index_map
        # instead of materializing the broadcast in HBM.
        attention = jnp.broadcast_to(attention, orig_shape)

    n = int(feature.size)
    if n == 0:
        return jnp.zeros(orig_shape, out_dtype)

    # ---- lane-dense (rows, lanes) layout; no padding whenever 128 | N ----
    if n % 128 == 0:
        lanes = None
        for cand in (512, 1024, 2048, 256, 128):   # prefer lanes giving >= 8 rows
            if n % cand == 0 and n // cand >= 8:
                lanes = cand
                break
        if lanes is None:
            for cand in (512, 256, 128):
                if n % cand == 0:
                    lanes = cand
                    break
        rows = n // lanes
        pad = 0
    else:
        # Rare fallback: one zero-pad per input + an output slice.
        lanes = 512 if n >= 8 * 512 else 128
        rows = _cdiv(n, lanes)
        pad = rows * lanes - n

    # ---- row tiling: big blocks (per-buffer budget = vmem_limit/8), multiple of 8 ----
    vmem_limit = _vmem_limit_bytes()
    itemsize = max(jnp.dtype(feature.dtype).itemsize,
                   jnp.dtype(attention.dtype).itemsize,
                   jnp.dtype(out_dtype).itemsize)
    per_buffer = vmem_limit // 8            # 3 streams x 2 pipeline buffers + slack
    if rows <= 8:
        block_rows = rows
    else:
        br = (per_buffer // (lanes * itemsize)) // 8 * 8
        block_rows = int(min(rows, max(8, br)))
    n_blocks = _cdiv(rows, block_rows)

    # Prefer an even number of grid steps so v7x's two TensorCores split the work evenly
    # (no effect on correctness; harmless on single-TC v5e/v6e).
    if n_blocks > 1 and n_blocks % 2 == 1:
        for tgt in (n_blocks + 1, n_blocks - 1):
            if tgt < 2:
                continue
            br = max(8, ((_cdiv(rows, tgt) + 7) // 8) * 8)
            if (br < rows and _cdiv(rows, br) % 2 == 0
                    and br * lanes * itemsize <= per_buffer):
                block_rows, n_blocks = br, _cdiv(rows, br)
                break

    def to_slab(x):
        flat = x.reshape(-1)
        if pad:
            flat = jnp.pad(flat, (0, pad))
        return flat.reshape(rows, lanes)

    f2 = to_slab(feature)
    a2 = to_slab(attention)

    out2 = pl.pallas_call(
        attention_connection_kernel,
        out_shape=jax.ShapeDtypeStruct((rows, lanes), out_dtype),
        grid_spec=pltpu.PrefetchScalarGridSpec(
            num_scalar_prefetch=0,
            grid=(n_blocks,),
            in_specs=[
                pl.BlockSpec(memory_space=pltpu.MemorySpace.SMEM),    # scalar param
                pl.BlockSpec((block_rows, lanes), lambda i: (i, 0)),  # feature
                pl.BlockSpec((block_rows, lanes), lambda i: (i, 0)),  # attention
            ],
            out_specs=pl.BlockSpec((block_rows, lanes), lambda i: (i, 0)),
        ),
        compiler_params=pltpu.CompilerParams(
            dimension_semantics=("parallel",),
            vmem_limit_bytes=vmem_limit,
        ),
        # NOTE: callers that donate `feature` may add input_output_aliases={1: 0}
        # to reuse its HBM buffer (footprint-only win); omitted here so the demo's
        # `feature` stays valid after the call.
    )(param, f2, a2)

    if pad:
        return out2.reshape(-1)[:n].reshape(orig_shape)
    return out2.reshape(orig_shape)


def attention_connection_reference(feature, attention, param):
    return (param + attention) * feature


if __name__ == "__main__":
    # Module usage: factor=1.0 -> param = [1.0]
    B, C, H, W = 2, 4, 16, 16

    key = jax.random.PRNGKey(0)
    kf, ka = jax.random.split(key)
    feature = jax.random.normal(kf, (B, C, H, W), dtype=jnp.float32)
    attention = jax.random.normal(ka, (B, C, H, W), dtype=jnp.float32)
    param = jnp.full((1,), 1.0, dtype=jnp.float32)   # nn.Parameter(torch.Tensor(1).fill_(1.0))

    out = attention_connection(feature, attention, param)
    out = jax.block_until_ready(out)

    ref = attention_connection_reference(feature, attention, param)
    assert out.shape == feature.shape
    assert out.dtype == ref.dtype
    assert jnp.allclose(out, ref, atol=1e-6, rtol=1e-6), "mismatch vs reference"

    print("KERNEL_OK")
</pallas_src>

<mosaic_0001>
module attributes {stable_mosaic.version = 11 : i64} {
  func.func @attention_connection_kernel(%arg0: i32, %arg1: memref<1xf32, #tpu.memory_space<smem>>, %arg2: memref<8x256xf32, #tpu.memory_space<vmem>>, %arg3: memref<8x256xf32, #tpu.memory_space<vmem>>, %arg4: memref<8x256xf32, #tpu.memory_space<vmem>>) attributes {dimension_semantics = [#tpu.dimension_semantics<parallel>], iteration_bounds = array<i64: 1>, scalar_prefetch = 0 : i64, scratch_operands = 0 : i64, tpu.core_type = #tpu.core_type<tc>, window_params = [{transform_indices = @transform_0, window_bounds = array<i64: 1>}, {transform_indices = @transform_1, window_bounds = array<i64: 8, 256>}, {transform_indices = @transform_2, window_bounds = array<i64: 8, 256>}, {transform_indices = @transform_3, window_bounds = array<i64: 8, 256>}]} {
    %c0 = arith.constant 0 : index
    %0 = memref.load %arg1[%c0] : memref<1xf32, #tpu.memory_space<smem>>
    %c0_0 = arith.constant 0 : index
    %c0_1 = arith.constant 0 : index
    %1 = vector.load %arg3[%c0_0, %c0_1] : memref<8x256xf32, #tpu.memory_space<vmem>>, vector<8x256xf32>
    %2 = vector.broadcast %0 : f32 to vector<8x256xf32>
    %3 = arith.addf %1, %2 : vector<8x256xf32>
    %c0_2 = arith.constant 0 : index
    %c0_3 = arith.constant 0 : index
    %4 = vector.load %arg2[%c0_2, %c0_3] : memref<8x256xf32, #tpu.memory_space<vmem>>, vector<8x256xf32>
    %5 = arith.mulf %3, %4 : vector<8x256xf32>
    %c0_4 = arith.constant 0 : index
    %c0_5 = arith.constant 0 : index
    %6 = vector.load %arg4[%c0_4, %c0_5] : memref<8x256xf32, #tpu.memory_space<vmem>>, vector<8x256xf32>
    tpu.vector_store %arg4[%c0_4, %c0_5], %5 {strides = array<i32>} : memref<8x256xf32, #tpu.memory_space<vmem>>, vector<8x256xf32>,
    return
  }
  func.func @transform_0(%arg0: i32) -> i32 {
    %c0_i32 = arith.constant 0 : i32
    %c0_i32_0 = arith.constant 0 : i32
    return %c0_i32 : i32
  }
  func.func @transform_1(%arg0: i32) -> (i32, i32) {
    %c0_i32 = arith.constant 0 : i32
    %c0_i32_0 = arith.constant 0 : i32
    return %arg0, %c0_i32 : i32, i32
  }
  func.func @transform_2(%arg0: i32) -> (i32, i32) {
    %c0_i32 = arith.constant 0 : i32
    %c0_i32_0 = arith.constant 0 : i32
    return %arg0, %c0_i32 : i32, i32
  }
  func.func @transform_3(%arg0: i32) -> (i32, i32) {
    %c0_i32 = arith.constant 0 : i32
    %c0_i32_0 = arith.constant 0 : i32
    return %arg0, %c0_i32 : i32, i32
  }
}

</mosaic_0001>

<bundles_post_ra>
// kernel: tpu_custom_call.1
= control target key start
LH: loop header
LB: loop body
LE: loop exit
PB: predicated region body
PF: predicated region fallthrough
CT: control target
= control target key end

     0   :  { %9 = vsyncpa [#allocation4], 0  ;;  %s190_s0 = inlined_call_operand.<no memory space> [shape: f32[1], index: 0, kind: input, shape index: {}]   ;;  %s191_s1 = inlined_call_operand.hbm [shape: f32[8,256], index: 1, kind: input, shape index: {}]   ;;  %s192_s2 = inlined_call_operand.hbm [shape: f32[8,256], index: 2, kind: input, shape index: {}]   ;;  %s193_s3 = inlined_call_operand.hbm [shape: f32[8,256], index: 3, kind: output, shape index: {}]  }
   0x1   :  { %10 = vsyncpa [#allocation7], 0 }
   0x2   :  { %11 = vsyncpa [#allocation5], 0  ;;  %s19_s14 = sshll.u32 %s191_s1, 4  ;;  %s155_s15 = smov [#allocation3]   ;;  %s20_s14 = int_to_ptr.hbm [resolvable:$true] %s19_s14 }
   0x3   :  { %s21_s16 = sshll.u32 %s155_s15, 4  ;;  %s30_s19 = sshll.u32 %s192_s2, 4  ;;  %s22_s16 = int_to_ptr.vmem [resolvable:$true] %s21_s16  ;;  %s31_s19 = int_to_ptr.hbm [resolvable:$true] %s30_s19 }
   0x4   :  { %24 = dma.hbm_to_vmem [thread:$0]  %s20_s14, 256, %s22_s16, [#allocation4]  }
   0x5   :  { %s156_s20 = smov [#allocation6]  }
   0x6   :  { %s32_s21 = sshll.u32 %s156_s20, 4  ;;  %s33_s21 = int_to_ptr.vmem [resolvable:$true] %s32_s21 }
   0x7   :  { %35 = dma.hbm_to_vmem [thread:$0]  %s31_s19, 256, %s33_s21, [#allocation7]  }
   0x8   :  { %149 = dma.done.wait [#allocation4], 256  }
   0x9   :  { %150 = vsyncadd [#allocation4], 4294967040 }
   0xa   :  { %151 = dma.done.wait [#allocation7], 256  }
   0xb   :  { %152 = vsyncadd [#allocation7], 4294967040  ;;  %v47_v0 = vstv %s190_s0  ;;  %v45_v1 = vld [vmem:[#allocation6] sm:$0xff]  ;;  %v50_v2 = vld [vmem:[#allocation3] sm:$0xff]  ;;  %s157_s2 = smov [#allocation8]   ;;  %s63_s26 = sshll.u32 %s193_s3, 4  ;;  %s64_s26 = int_to_ptr.hbm [resolvable:$true] %s63_s26 }
   0xc   :  { %v46_v3 = vld [vmem:[#allocation6 + $0x8] sm:$0xff]  ;;  %v48_v4 = vadd.f32 %v47_v0, %v45_v1  ;;  %v51_v6 = vld [vmem:[#allocation3 + $0x8] sm:$0xff]  ;;  %s61_s23 = sshll.u32 %s157_s2, 4  ;;  %s62_s23 = int_to_ptr.vmem [resolvable:$true] %s61_s23 }
   0xd   :  { %v49_v5 = vadd.f32 %v47_v0, %v46_v3 }
   0xe   :  { %v52_v7 = vmul.f32 %v50_v2, %v48_v4 }
   0xf   :  { %v53_v8 = vmul.f32 %v51_v6, %v49_v5 }
  0x10   :  { %54 = vst [vmem:[#allocation8] sm:$0xff] %v52_v7 }
  0x11   :  { %55 = vst [vmem:[#allocation8 + $0x8] sm:$0xff] %v53_v8 }
  0x12   :  { %66 = dma.vmem_to_hbm [thread:$0]  %s62_s23, 256, %s64_s26, [#allocation5]  }
  0x13   :  { %153 = dma.done.wait [#allocation5], 256  }
  0x14   :  { %154 = vsyncadd [#allocation5], 4294967040 }
  0x15   :  { %71 = vsyncpa [#allocation4], 1 }
  0x16   :  { %72 = vsyncpa [#allocation7], 1 }
  0x17   :  { %73 = vsyncpa [#allocation5], 1 }

</bundles_post_ra>
